<compile_context>
chip_gen: v6e
topology: v6e:2x2x1
jax: 0.10.0
libtpu: 0.0.40
codegen_flags: <defaults>
</compile_context>

<pallas_src>
import jax
import jax.numpy as jnp
from jax.experimental import pallas as pl
from jax.experimental.pallas import tpu as pltpu  # noqa: F401  (TPU backend assumed)


def _original_fusion_kernel(a_ref, l_ref, w_ref, o_ref):
    """Single-invocation body: entire batch resident in VMEM.

    a_ref, l_ref, o_ref : [B, C, N]  channel-major (lane axis = N)
    w_ref               : [C, C]     conv1x1 weight (out_ch, in_ch)
    """
    B = a_ref.shape[0]
    N = a_ref.shape[2]

    # Elementwise fusion on the VPU, f32 throughout (v5e has no bf16 VPU path).
    fuse = a_ref[...] * l_ref[...]                                  # [B, C, N]

    # One wide MXU push: concat the per-batch tiles along lanes -> [C, B*N].
    # Lane offsets are multiples of 128, so concat/split are tile-aligned.
    wide = jnp.concatenate([fuse[b] for b in range(B)], axis=-1)    # [C, B*N]

    # 1x1 conv == channel-mixing matmul: o[co, n] = sum_ci W[co, ci] * fuse[ci, n]
    out = jnp.dot(w_ref[...], wide, preferred_element_type=jnp.float32)  # [C, B*N]

    for b in range(B):
        o_ref[b] = out[:, b * N:(b + 1) * N].astype(o_ref.dtype)


def original_fusion(A, L, w):
    """A, L: [B, C, H, W] float32; w: [C, C] conv1x1 weight. Returns [B, C, H, W]."""
    B, C, H, W = A.shape
    N = H * W

    # NCHW -> [B, C, N]: pure reshape, no transpose, no extra HBM pass.
    a_t = A.reshape(B, C, N)
    l_t = L.reshape(B, C, N)

    full_spec = pl.BlockSpec((B, C, N), lambda: (0, 0, 0))
    w_spec = pl.BlockSpec((C, C), lambda: (0, 0))

    cost = pl.CostEstimate(
        flops=2 * B * C * C * N,
        transcendentals=0,
        bytes_accessed=(3 * B * C * N + C * C) * 4,
    )

    out = pl.pallas_call(
        _original_fusion_kernel,
        out_shape=jax.ShapeDtypeStruct((B, C, N), jnp.float32),
        in_specs=[full_spec, full_spec, w_spec],
        out_specs=full_spec,
        cost_estimate=cost,
    )(a_t, l_t, w)

    return out.reshape(B, C, H, W)


def _reference(A, L, w):
    """Pure-JAX reference replicating the PyTorch forward exactly."""
    fuse = A * L
    # Conv2d(C, C, kernel_size=1, bias=False)
    return jnp.einsum('oc,bchw->bohw', w, fuse)


if __name__ == "__main__":
    B, C, H, W = 2, 32, 16, 16

    key = jax.random.PRNGKey(0)
    k_a, k_l, k_w = jax.random.split(key, 3)

    A = jax.random.normal(k_a, (B, C, H, W), dtype=jnp.float32)
    L = jax.random.normal(k_l, (B, C, H, W), dtype=jnp.float32)

    # Conv2d 1x1 weight [C, C, 1, 1] squeezed to [C, C], PyTorch-style init.
    bound = 1.0 / (C ** 0.5)
    w = jax.random.uniform(k_w, (C, C), jnp.float32, -bound, bound)

    out = original_fusion(A, L, w)
    out = jax.block_until_ready(out)

    ref = _reference(A, L, w)
    assert out.shape == (B, C, H, W)
    assert jnp.allclose(out, ref, atol=1e-4, rtol=1e-4), \
        f"max abs err {jnp.max(jnp.abs(out - ref))}"

    print("KERNEL_OK")
</pallas_src>

<mosaic_0001>
module attributes {stable_mosaic.version = 11 : i64} {
  func.func @_original_fusion_kernel(%arg0: memref<2x32x256xf32, #tpu.memory_space<vmem>>, %arg1: memref<2x32x256xf32, #tpu.memory_space<vmem>>, %arg2: memref<32x32xf32, #tpu.memory_space<vmem>>, %arg3: memref<2x32x256xf32, #tpu.memory_space<vmem>>) attributes {dimension_semantics = [], scalar_prefetch = 0 : i64, scratch_operands = 0 : i64, tpu.core_type = #tpu.core_type<tc>} {
    %c0 = arith.constant 0 : index
    %c0_0 = arith.constant 0 : index
    %c0_1 = arith.constant 0 : index
    %0 = vector.load %arg0[%c0, %c0_0, %c0_1] : memref<2x32x256xf32, #tpu.memory_space<vmem>>, vector<2x32x256xf32>
    %c0_2 = arith.constant 0 : index
    %c0_3 = arith.constant 0 : index
    %c0_4 = arith.constant 0 : index
    %1 = vector.load %arg1[%c0_2, %c0_3, %c0_4] : memref<2x32x256xf32, #tpu.memory_space<vmem>>, vector<2x32x256xf32>
    %2 = arith.mulf %0, %1 : vector<2x32x256xf32>
    %3 = vector.extract_strided_slice %2 {offsets = [0, 0, 0], sizes = [1, 32, 256], strides = [1, 1, 1]} : vector<2x32x256xf32> to vector<1x32x256xf32>
    %4 = vector.shape_cast %3 : vector<1x32x256xf32> to vector<32x256xf32>
    %5 = vector.extract_strided_slice %2 {offsets = [1, 0, 0], sizes = [1, 32, 256], strides = [1, 1, 1]} : vector<2x32x256xf32> to vector<1x32x256xf32>
    %6 = vector.shape_cast %5 : vector<1x32x256xf32> to vector<32x256xf32>
    %7 = tpu.concatenate %4, %6 in 1 : vector<32x256xf32>, vector<32x256xf32> -> vector<32x512xf32>
    %c0_5 = arith.constant 0 : index
    %c0_6 = arith.constant 0 : index
    %8 = vector.load %arg2[%c0_5, %c0_6] : memref<32x32xf32, #tpu.memory_space<vmem>>, vector<32x32xf32>
    %cst = arith.constant dense<0.000000e+00> : vector<32x512xf32>
    %9 = tpu.matmul %8, %7, %cst {dimension_numbers = #tpu.dot_dimension_numbers<[1], [0], [0], [1], [0, 0, 1, 1], [], []>} : vector<32x32xf32>, vector<32x512xf32>, vector<32x512xf32> -> vector<32x512xf32>
    %10 = vector.extract_strided_slice %9 {offsets = [0, 0], sizes = [32, 256], strides = [1, 1]} : vector<32x512xf32> to vector<32x256xf32>
    %c0_7 = arith.constant 0 : index
    %c0_8 = arith.constant 0 : index
    %c0_9 = arith.constant 0 : index
    %11 = vector.load %arg3[%c0_7, %c0_8, %c0_9] : memref<2x32x256xf32, #tpu.memory_space<vmem>>, vector<1x32x256xf32>
    %12 = vector.shape_cast %11 : vector<1x32x256xf32> to vector<32x256xf32>
    %13 = vector.shape_cast %10 : vector<32x256xf32> to vector<1x32x256xf32>
    tpu.vector_store %arg3[%c0_7, %c0_8, %c0_9], %13 {strides = array<i32>} : memref<2x32x256xf32, #tpu.memory_space<vmem>>, vector<1x32x256xf32>,
    %14 = vector.extract_strided_slice %9 {offsets = [0, 256], sizes = [32, 256], strides = [1, 1]} : vector<32x512xf32> to vector<32x256xf32>
    %c1 = arith.constant 1 : index
    %c0_10 = arith.constant 0 : index
    %c0_11 = arith.constant 0 : index
    %15 = vector.load %arg3[%c1, %c0_10, %c0_11] : memref<2x32x256xf32, #tpu.memory_space<vmem>>, vector<1x32x256xf32>
    %16 = vector.shape_cast %15 : vector<1x32x256xf32> to vector<32x256xf32>
    %17 = vector.shape_cast %14 : vector<32x256xf32> to vector<1x32x256xf32>
    tpu.vector_store %arg3[%c1, %c0_10, %c0_11], %17 {strides = array<i32>} : memref<2x32x256xf32, #tpu.memory_space<vmem>>, vector<1x32x256xf32>,
    return
  }
}

</mosaic_0001>

<bundles_post_ra>
// kernel: tpu_custom_call.1
= control target key start
LH: loop header
LB: loop body
LE: loop exit
PB: predicated region body
PF: predicated region fallthrough
CT: control target
= control target key end

     0   :  { %8 = vsyncpa [#allocation3], 0  ;;  %s503_s0 = inlined_call_operand.hbm [shape: f32[2,32,256], index: 0, kind: input, shape index: {}]   ;;  %s504_s1 = inlined_call_operand.hbm [shape: f32[2,32,256], index: 1, kind: input, shape index: {}]   ;;  %s505_s2 = inlined_call_operand.hbm [shape: f32[32,32], index: 2, kind: input, shape index: {}]   ;;  %s506_s3 = inlined_call_operand.hbm [shape: f32[2,32,256], index: 3, kind: output, shape index: {}]  }
   0x1   :  { %9 = vsyncpa [#allocation6], 0 }
   0x2   :  { %10 = vsyncpa [#allocation4], 0  ;;  %s437_s12 = smov [#allocation5]   ;;  %s438_s14 = smov [#allocation2]  }
   0x3   :  { %s28_s13 = sshll.u32 %s437_s12, 4  ;;  %s16_s15 = sshll.u32 %s438_s14, 4  ;;  %s29_s13 = int_to_ptr.vmem [resolvable:$true] %s28_s13  ;;  %s17_s15 = int_to_ptr.vmem [resolvable:$true] %s16_s15 }
   0x4   :  { %s359_s16 = scalar_lea.vmem %s29_s13, 2048  ;;  %p364_p1 = scmp.lt.s32.totalorder %s29_s13, %s29_s13 }
   0x5   :  { %p360_p0 = scmp.ne.s32.totalorder %s29_s13, %s359_s16  ;;  %p365_p2 = scmp.lt.s32.totalorder %s359_s16, %s359_s16 }
   0x7   :  { %p366_p3 = por %p365_p2, %p364_p1 }
   0x9   :  { %p367_p4 = pnand %p366_p3, %p360_p0 }
   0xb   :  { %370 = shalt.err (!%p367_p4)
}
   0xc   :  { %s439_s17 = smov 256   ;;  %s440_s18 = smov 16  }
   0xd   :  { %34 = dma.hbm_to_vmem [thread:$0]  %s504_s1, 2048, %s29_s13, [#allocation6], %s439_s17, %s439_s17, %s440_s18  }
   0xe   :  { %s379_s21 = scalar_lea.vmem %s17_s15, 2048  ;;  %p384_p6 = scmp.lt.s32.totalorder %s17_s15, %s17_s15 }
   0xf   :  { %p380_p5 = scmp.ne.s32.totalorder %s17_s15, %s379_s21  ;;  %p385_p7 = scmp.lt.s32.totalorder %s379_s21, %s379_s21 }
  0x11   :  { %p386_p8 = por %p385_p7, %p384_p6 }
  0x13   :  { %p387_p9 = pnand %p386_p8, %p380_p5 }
  0x15   :  { %390 = shalt.err (!%p387_p9)
}
  0x16   :  { %22 = dma.hbm_to_vmem [thread:$0]  %s503_s0, 2048, %s17_s15, [#allocation3], %s439_s17, %s439_s17, %s440_s18  }
  0x17   :  { %s441_s24 = smov [#allocation7]  }
  0x18   :  { %s40_s25 = sshll.u32 %s441_s24, 4  ;;  %s41_s25 = int_to_ptr.vmem [resolvable:$true] %s40_s25 }
  0x19   :  { %s399_s26 = scalar_lea.vmem %s41_s25, 512  ;;  %p404_p11 = scmp.lt.s32.totalorder %s41_s25, %s41_s25 }
  0x1a   :  { %p400_p10 = scmp.ne.s32.totalorder %s41_s25, %s399_s26  ;;  %p405_p12 = scmp.lt.s32.totalorder %s399_s26, %s399_s26 }
  0x1c   :  { %p406_p13 = por %p405_p12, %p404_p11 }
  0x1e   :  { %p407_p0 = pnand %p406_p13, %p400_p10 }
  0x20   :  { %410 = shalt.err (!%p407_p0)
}
  0x21   :  { %s442_s1 = smov 128   ;;  %s443_s27 = smov 8  }
  0x22   :  { %46 = dma.hbm_to_vmem [thread:$0]  %s505_s2, 512, %s41_s25, [#allocation6], %s442_s1, %s442_s1, %s443_s27  }
  0x23   :  { %431 = dma.done.wait [#allocation3], 2048  }
  0x24   :  { %432 = vsyncadd [#allocation3], 4294965248 }
  0x25   :  { %433 = dma.done.wait [#allocation6], 2560  }
  0x26   :  { %434 = vsyncadd [#allocation6], 4294964736  ;;  %v444_v0 = vmov 0.0   ;;  %v63_v1 = vld [vmem:[#allocation2 + $0x38] sm:$0xff]  ;;  %v62_v6 = vld [vmem:[#allocation2 + $0x30] sm:$0xff]  ;;  %vm108_vm0 = vcmask 261120  }
  0x27   :  { %185 = vmatprep.mubr.f32.mxu0 %v444_v0  ;;  %274 = vmatprep.mubr.f32.mxu1 %v444_v0  ;;  %v79_v2 = vld [vmem:[#allocation5 + $0x38] sm:$0xff]  ;;  %v78_v7 = vld [vmem:[#allocation5 + $0x30] sm:$0xff]  ;;  %v61_v12 = vld [vmem:[#allocation2 + $0x28] sm:$0xff]  ;;  %s445_s0 = smov [#allocation8]  }
  0x28   :  { %v71_v3 = vld [vmem:[#allocation2 + $0x78] sm:$0xff]  ;;  %v95_v4 = vmul.f32 %v79_v2, %v63_v1  ;;  %v94_v9 = vmul.f32 %v78_v7, %v62_v6  ;;  %v70_v10 = vld [vmem:[#allocation2 + $0x70] sm:$0xff]  ;;  %v77_v14 = vld [vmem:[#allocation5 + $0x28] sm:$0xff]  ;;  %s321_s2 = sshll.u32 %s445_s0, 4  ;;  %s322_s2 = int_to_ptr.vmem [resolvable:$true] %s321_s2 }
  0x29   :  { %v87_v5 = vld [vmem:[#allocation5 + $0x78] sm:$0xff]  ;;  %v86_v11 = vld [vmem:[#allocation5 + $0x70] sm:$0xff]  ;;  %v69_v15 = vld [vmem:[#allocation2 + $0x68] sm:$0xff]  ;;  %v93_v17 = vmul.f32 %v77_v14, %v61_v12  ;;  %s411_s30 = scalar_lea.vmem %s322_s2, 2048  ;;  %p416_p2 = scmp.lt.s32.totalorder %s322_s2, %s322_s2 }
  0x2a   :  { %v103_v8 = vmul.f32 %v87_v5, %v71_v3  ;;  %145 = vmatprep.subr.mxu0 %v95_v4  ;;  %v102_v13 = vmul.f32 %v86_v11, %v70_v10  ;;  %v85_v16 = vld [vmem:[#allocation5 + $0x68] sm:$0xff]  ;;  %v60_v19 = vld [vmem:[#allocation2 + $0x20] sm:$0xff]  ;;  %v59_v24 = vld [vmem:[#allocation2 + $0x18] sm:$0xff]  ;;  %p412_p1 = scmp.ne.s32.totalorder %s322_s2, %s411_s30  ;;  %p417_p3 = scmp.lt.s32.totalorder %s411_s30, %s411_s30 }
  0x2b   :  { %146 = vmatpush1.msra.mxu0 %v94_v9  ;;  %v101_v18 = vmul.f32 %v85_v16, %v69_v15  ;;  %v76_v20 = vld [vmem:[#allocation5 + $0x20] sm:$0xff]  ;;  %v75_v25 = vld [vmem:[#allocation5 + $0x18] sm:$0xff]  ;;  %v58_v30 = vld [vmem:[#allocation2 + $0x10] sm:$0xff] }
  0x2c   :  { %234 = vmatprep.subr.mxu1 %v103_v8  ;;  %v68_v21 = vld [vmem:[#allocation2 + $0x60] sm:$0xff]  ;;  %v92_v22 = vmul.f32 %v76_v20, %v60_v19  ;;  %147 = vmatprep.subr.mxu0 %v93_v17  ;;  %v91_v27 = vmul.f32 %v75_v25, %v59_v24  ;;  %v67_v28 = vld [vmem:[#allocation2 + $0x58] sm:$0xff]  ;;  %v74_v32 = vld [vmem:[#allocation5 + $0x10] sm:$0xff]  ;;  %p418_p4 = por %p417_p3, %p416_p2 }
  0x2d   :  { %235 = vmatpush1.msra.mxu1 %v102_v13  ;;  %v84_v23 = vld [vmem:[#allocation5 + $0x60] sm:$0xff]  ;;  %v83_v29 = vld [vmem:[#allocation5 + $0x58] sm:$0xff]  ;;  %v66_v33 = vld [vmem:[#allocation2 + $0x50] sm:$0xff]  ;;  %v90_v35 = vmul.f32 %v74_v32, %v58_v30 }
  0x2e   :  { %236 = vmatprep.subr.mxu1 %v101_v18  ;;  %v100_v26 = vmul.f32 %v84_v23, %v68_v21  ;;  %148 = vmatpush1.msra.mxu0 %v92_v22  ;;  %v99_v31 = vmul.f32 %v83_v29, %v67_v28  ;;  %v82_v34 = vld [vmem:[#allocation5 + $0x50] sm:$0xff]  ;;  %v57_v37 = vld [vmem:[#allocation2 + $0x8] sm:$0xff]  ;;  %v56_v42 = vld [vmem:[#allocation2] sm:$0xff]  ;;  %p419_p5 = pnand %p418_p4, %p412_p1 }
  0x2f   :  { %149 = vmatprep.subr.mxu0 %v91_v27  ;;  %v98_v36 = vmul.f32 %v82_v34, %v66_v33  ;;  %v73_v38 = vld [vmem:[#allocation5 + $0x8] sm:$0xff]  ;;  %v72_v43 = vld [vmem:[#allocation5] sm:$0xff]  ;;  %v106_v51 = vld [vmem:[#allocation7 + $0x10] sm:$0xff] }
  0x30   :  { %237 = vmatpush1.msra.mxu1 %v100_v26  ;;  %v65_v39 = vld [vmem:[#allocation2 + $0x48] sm:$0xff]  ;;  %v89_v40 = vmul.f32 %v73_v38, %v57_v37  ;;  %150 = vmatpush1.msra.mxu0 %v90_v35  ;;  %v88_v45 = vmul.f32 %v72_v43, %v56_v42  ;;  %v64_v46 = vld [vmem:[#allocation2 + $0x40] sm:$0xff]  ;;  %v107_v52 = vld [vmem:[#allocation7 + $0x18] sm:$0xff] }
  0x31   :  { %238 = vmatprep.subr.mxu1 %v99_v31  ;;  %v81_v41 = vld [vmem:[#allocation5 + $0x48] sm:$0xff]  ;;  %v80_v47 = vld [vmem:[#allocation5 + $0x40] sm:$0xff] }
  0x32   :  { %239 = vmatpush1.msra.mxu1 %v98_v36  ;;  %v97_v44 = vmul.f32 %v81_v41, %v65_v39  ;;  %v104_v48 = vld [vmem:[#allocation7] sm:$0xff]  ;;  %151 = vmatprep.subr.mxu0 %v89_v40  ;;  %v96_v49 = vmul.f32 %v80_v47, %v64_v46  ;;  %v105_v50 = vld [vmem:[#allocation7 + $0x8] sm:$0xff] }
  0x33   :  { %152 = vmatpush1.msra.mxu0 %v88_v45 }
  0x34   :  { %240 = vmatprep.subr.mxu1 %v97_v44  ;;  %334 = vmatmul.mubr.msk.f32.vlgmr.msra.gmra.mxu0 %vm108_vm0, %v104_v48 }
  0x35   :  { %241 = vmatpush1.msra.mxu1 %v96_v49  ;;  %191 = vmatprep.mubr.f32.mxu0 %v444_v0 }
  0x36   :  { %338 = vmatmul.mubr.msk.f32.vlgmr.msra.gmra.mxu1 %vm108_vm0, %v104_v48 }
  0x37   :  { %280 = vmatprep.mubr.f32.mxu1 %v444_v0 }
  0x38   :  { %335 = vmatmul.mubr.msk.f32.gmra.mxu0 %vm108_vm0, %v105_v50 }
  0x39   :  { %197 = vmatprep.mubr.f32.mxu0 %v444_v0 }
  0x3a   :  { %339 = vmatmul.mubr.msk.f32.gmra.mxu1 %vm108_vm0, %v105_v50 }
  0x3b   :  { %286 = vmatprep.mubr.f32.mxu1 %v444_v0 }
  0x3c   :  { %336 = vmatmul.mubr.msk.f32.gmra.mxu0 %vm108_vm0, %v106_v51 }
  0x3d   :  { %203 = vmatprep.mubr.f32.mxu0 %v444_v0 }
  0x3e   :  { %340 = vmatmul.mubr.msk.f32.gmra.mxu1 %vm108_vm0, %v106_v51 }
  0x3f   :  { %292 = vmatprep.mubr.f32.mxu1 %v444_v0 }
  0x40   :  { %337 = vmatmul.mubr.msk.f32.gmra.mxu0 %vm108_vm0, %v107_v52 }
  0x42   :  { %341 = vmatmul.mubr.msk.f32.gmra.mxu1 %vm108_vm0, %v107_v52 }
  0xf4   :  { %v187_v53 = vpop.f32.mrf.mxu0 }
  0xf5   :  { %299 = vst [vmem:[#allocation8] sm:$0xff] %v187_v53 }
  0xf6   :  { %v276_v54 = vpop.f32.mrf.mxu1  ;;  %v189_v55 = vpop.f32.mrf.mxu0 }
  0xf7   :  { %308 = vst [vmem:[#allocation8 + $0x40] sm:$0xff] %v276_v54  ;;  %300 = vst [vmem:[#allocation8 + $0x8] sm:$0xff] %v189_v55 }
  0xf8   :  { %v278_v56 = vpop.f32.mrf.mxu1  ;;  %v193_v57 = vpop.f32.mrf.mxu0 }
  0xf9   :  { %309 = vst [vmem:[#allocation8 + $0x48] sm:$0xff] %v278_v56  ;;  %301 = vst [vmem:[#allocation8 + $0x10] sm:$0xff] %v193_v57 }
  0xfa   :  { %v282_v58 = vpop.f32.mrf.mxu1  ;;  %v195_v59 = vpop.f32.mrf.mxu0 }
  0xfb   :  { %310 = vst [vmem:[#allocation8 + $0x50] sm:$0xff] %v282_v58  ;;  %302 = vst [vmem:[#allocation8 + $0x18] sm:$0xff] %v195_v59 }
  0xfc   :  { %v284_v60 = vpop.f32.mrf.mxu1  ;;  %v199_v61 = vpop.f32.mrf.mxu0 }
  0xfd   :  { %311 = vst [vmem:[#allocation8 + $0x58] sm:$0xff] %v284_v60  ;;  %303 = vst [vmem:[#allocation8 + $0x20] sm:$0xff] %v199_v61 }
  0xfe   :  { %v288_v62 = vpop.f32.mrf.mxu1  ;;  %v201_v63 = vpop.f32.mrf.mxu0 }
  0xff   :  { %312 = vst [vmem:[#allocation8 + $0x60] sm:$0xff] %v288_v62  ;;  %304 = vst [vmem:[#allocation8 + $0x28] sm:$0xff] %v201_v63 }
 0x100   :  { %v290_v0 = vpop.f32.mrf.mxu1  ;;  %v205_v1 = vpop.f32.mrf.mxu0 }
 0x101   :  { %313 = vst [vmem:[#allocation8 + $0x68] sm:$0xff] %v290_v0  ;;  %305 = vst [vmem:[#allocation8 + $0x30] sm:$0xff] %v205_v1 }
 0x102   :  { %v294_v2 = vpop.f32.mrf.mxu1  ;;  %v207_v3 = vpop.f32.mrf.mxu0 }
 0x103   :  { %314 = vst [vmem:[#allocation8 + $0x70] sm:$0xff] %v294_v2  ;;  %306 = vst [vmem:[#allocation8 + $0x38] sm:$0xff] %v207_v3 }
 0x104   :  { %v296_v4 = vpop.f32.mrf.mxu1 }
 0x105   :  { %315 = vst [vmem:[#allocation8 + $0x78] sm:$0xff] %v296_v4 }
 0x106   :  { %422 = shalt.err (!%p419_p5)
}
 0x107   :  { %327 = dma.vmem_to_hbm [thread:$0]  %s322_s2, 2048, %s506_s3, [#allocation4], %s439_s17, %s439_s17, %s440_s18  }
 0x108   :  { %435 = dma.done.wait [#allocation4], 2048  }
 0x109   :  { %436 = vsyncadd [#allocation4], 4294965248 }
 0x10a   :  { %331 = vsyncpa [#allocation3], 1 }
 0x10b   :  { %332 = vsyncpa [#allocation6], 1 }
 0x10c   :  { %333 = vsyncpa [#allocation4], 1 }

</bundles_post_ra>
